<compile_context>
chip_gen: v6e
topology: v6e:2x2x1
jax: 0.10.0
libtpu: 0.0.40
codegen_flags: <defaults>
</compile_context>

<pallas_src>
import jax
import jax.numpy as jnp
from jax.experimental import pallas as pl
from jax.experimental.pallas import tpu as pltpu


_TILE_BYTES = 4 * 1024 * 1024   # per-block budget; 4 live buffers ~= 16 MiB VMEM
_MAX_LANES = 2048               # lane-dense column cap (multiple of 128)
_VMEM_LIMIT = 32 * 1024 * 1024  # explicit scoped-VMEM limit (safe on v5e/v6e/v7x)


def _identity_kernel(x_ref, o_ref):
    # Hot path: straight copy of the current VMEM tile.
    o_ref[...] = x_ref[...]


def _lane_dense_2d_shape(shape, total):
    """Pick a (rows, cols) reshape with cols lane-dense (multiple of 128) if possible."""
    if total % 128 == 0:
        max_c = (min(_MAX_LANES, total) // 128) * 128
        for c in range(max_c, 0, -128):
            if total % c == 0:
                return total // c, c
    # Fallback: keep the original trailing dim as the lane axis.
    cols = shape[-1] if len(shape) >= 1 else 1
    return total // cols, cols


def identity_pallas(x, *, alias_input=False):
    """Identity forward pass via a Pallas TPU copy kernel (out == x, bit-exact)."""
    orig_shape = x.shape
    total = x.size
    if total == 0:
        return x  # nothing to copy

    itemsize = jnp.dtype(x.dtype).itemsize
    R, C = _lane_dense_2d_shape(orig_shape, total)
    flat = x.reshape(R, C)

    # Column tile: a lane-dense multiple of 128 (ragged edge masked) or the full width.
    if C > _MAX_LANES:
        tc = _MAX_LANES
    else:
        tc = C  # full-dim block is always legal, even if not 128-aligned
    # Row tile: fill the per-block byte budget; multiple of 8 or the full height.
    tr = max(8, (_TILE_BYTES // max(1, tc * itemsize)) // 8 * 8)
    if tr >= R:
        tr = R  # full-dim block is always legal, even if not 8-aligned

    nbytes = total * itemsize

    out = pl.pallas_call(
        _identity_kernel,
        out_shape=jax.ShapeDtypeStruct((R, C), x.dtype),
        grid=(pl.cdiv(R, tr), pl.cdiv(C, tc)),
        in_specs=[pl.BlockSpec((tr, tc), lambda i, j: (i, j))],
        out_specs=pl.BlockSpec((tr, tc), lambda i, j: (i, j)),
        compiler_params=pltpu.CompilerParams(
            dimension_semantics=("parallel", "parallel"),
            vmem_limit_bytes=_VMEM_LIMIT,
        ),
        cost_estimate=pl.CostEstimate(
            flops=0, transcendentals=0, bytes_accessed=2 * nbytes),
        input_output_aliases=({0: 0} if alias_input else {}),
    )(flat)

    return out.reshape(orig_shape)


if __name__ == "__main__":
    key = jax.random.PRNGKey(0)
    # NCHW-style input consistent with the module's usage: batch=2, channels=4,
    # spatial 16x16 — Identity passes it through unchanged.
    x = jax.random.normal(key, (2, 4, 16, 16), dtype=jnp.float32)

    identity = jax.jit(identity_pallas)
    y = identity(x)
    y = jax.block_until_ready(y)

    assert y.shape == x.shape, (y.shape, x.shape)
    assert y.dtype == x.dtype, (y.dtype, x.dtype)
    assert bool(jnp.all(y == x)), "Identity output mismatch"

    print("KERNEL_OK")
</pallas_src>

<mosaic_0001>
module attributes {stable_mosaic.version = 11 : i64} {
  func.func @_identity_kernel(%arg0: i32, %arg1: i32, %arg2: memref<1x2048xf32, #tpu.memory_space<vmem>>, %arg3: memref<1x2048xf32, #tpu.memory_space<vmem>>) attributes {dimension_semantics = [#tpu.dimension_semantics<parallel>, #tpu.dimension_semantics<parallel>], iteration_bounds = array<i64: 1, 1>, scalar_prefetch = 0 : i64, scratch_operands = 0 : i64, tpu.core_type = #tpu.core_type<tc>, window_params = [{transform_indices = @transform_0, window_bounds = array<i64: 1, 2048>}, {transform_indices = @transform_1, window_bounds = array<i64: 1, 2048>}]} {
    %c0 = arith.constant 0 : index
    %c0_0 = arith.constant 0 : index
    %0 = vector.load %arg2[%c0, %c0_0] : memref<1x2048xf32, #tpu.memory_space<vmem>>, vector<1x2048xf32>
    %c0_1 = arith.constant 0 : index
    %c0_2 = arith.constant 0 : index
    %1 = vector.load %arg3[%c0_1, %c0_2] : memref<1x2048xf32, #tpu.memory_space<vmem>>, vector<1x2048xf32>
    tpu.vector_store %arg3[%c0_1, %c0_2], %0 {strides = array<i32>} : memref<1x2048xf32, #tpu.memory_space<vmem>>, vector<1x2048xf32>,
    return
  }
  func.func @transform_0(%arg0: i32, %arg1: i32) -> (i32, i32) {
    %c0_i32 = arith.constant 0 : i32
    return %arg0, %arg1 : i32, i32
  }
  func.func @transform_1(%arg0: i32, %arg1: i32) -> (i32, i32) {
    %c0_i32 = arith.constant 0 : i32
    return %arg0, %arg1 : i32, i32
  }
}

</mosaic_0001>

<bundles_post_ra>
// kernel: identity_pallas.1
= control target key start
LH: loop header
LB: loop body
LE: loop exit
PB: predicated region body
PF: predicated region fallthrough
CT: control target
= control target key end

     0   :  { %s38_s0 = inlined_call_operand.vmem [shape: f32[1,2048], index: 0, kind: input, shape index: {}]   ;;  %s39_s1 = inlined_call_operand.vmem [shape: f32[1,2048], index: 1, kind: output, shape index: {}]  }
   0x1   :  { %v8_v0 = vld [vmem:[%s38_s0] sm:$0xff]  ;;  %v9_v1 = vld [vmem:[%s38_s0 + $0x8] sm:$0xff] }
   0x2   :  { %10 = vst [vmem:[%s39_s1] sm:$0xff] %v8_v0  ;;  %11 = vst [vmem:[%s39_s1 + $0x8] sm:$0xff] %v9_v1 }

</bundles_post_ra>
